<compile_context>
chip_gen: v6e
topology: v6e:2x2x1
jax: 0.10.0
libtpu: 0.0.40
codegen_flags: <defaults>
</compile_context>

<pallas_src>
import functools

import jax
import jax.numpy as jnp
from jax import lax
from jax.experimental import pallas as pl
from jax.experimental.pallas import tpu as pltpu


_NEG_FILL = -1.0e30          # bias fill for padded action lanes
_MAX_BATCH_TILE = 4096       # grid-overhead amortization saturates around here
_LANES = 128


def _round_up(x, m):
    return (x + m - 1) // m * m


def _vmem_capacity_bytes():
    try:
        return int(pltpu.get_tpu_info().vmem_capacity_bytes)
    except Exception:        # conservative fallback = v7x (64 MiB per core)
        return 64 * 1024 * 1024


def _pick_batch_tile(D, a_out, vmem_limit_bytes):
    """Largest batch tile (multiple of 8, <= _MAX_BATCH_TILE) such that the
    double-buffered x and output tiles plus the resident (double-buffered)
    weight/bias blocks fit inside the requested scoped-VMEM limit."""
    d_lanes = max(_round_up(D, _LANES), _LANES)            # lane padding of x tile
    per_row = 4 * (2 * d_lanes + 2 * a_out)                # 2 x bufs + 2 out bufs
    resident = 4 * 2 * (_round_up(D, 8) * a_out + 8 * a_out)  # W + bias (2 bufs each)
    budget = int(vmem_limit_bytes * 0.9) - resident
    tb = max(budget // per_row, 8)
    tb = min(tb, _MAX_BATCH_TILE)
    return (tb // 8) * 8


def _policy_kernel(x_ref, wt_ref, b_ref, out_ref, *, num_actions):
    x = x_ref[...]                                    # (TB, D)   f32
    wt = wt_ref[...]                                  # (D,  AO)  f32, resident
    b = b_ref[...]                                    # (1,  AO)  f32, resident

    # actor_linear over the lane-padded head: padded columns get logit ~ -1e30.
    logit = jnp.dot(x, wt, preferred_element_type=jnp.float32) + b   # (TB, AO)

    # numerically stable softmax statistics (single exp pass, row max reused).
    m = jnp.max(logit, axis=-1, keepdims=True)        # pad lanes never win
    z = logit - m
    e = jnp.exp(z)                                    # pad lanes underflow to 0
    s = jnp.sum(e, axis=-1, keepdims=True)
    log_s = jnp.log(s)

    log_prob = z - log_s                              # log_softmax(logit, dim=1)
    # entropy = -(log_prob * prob).sum(1) = log(s) - sum(z*e)/s
    # exact divide on the narrow (TB, 1) column -> exact entropy, negligible cost.
    ent = log_s - jnp.sum(z * e, axis=-1, keepdims=True) / s

    # test=True action: argmax over dim=1 (first occurrence on ties), reusing m.
    col = lax.broadcasted_iota(jnp.int32, logit.shape, 1)
    act = jnp.min(jnp.where(logit == m, col, jnp.int32(logit.shape[-1])),
                  axis=-1, keepdims=True).astype(jnp.float32)

    # pack one lane-dense slab: [0, A) = log_prob, A = entropy, A+1 = action.
    slab = jnp.where(col == num_actions, ent, log_prob)
    slab = jnp.where(col == num_actions + 1, act, slab)
    out_ref[...] = slab                               # single unmasked full store


def prepare_actor_params(weight, bias):
    """One-time layout prep: nn.Linear weight (A, D) -> lane-padded (D, AO) with
    zero pad columns; bias -> (1, AO) with pad lanes at -1e30 so padded logits
    can never contaminate the softmax / argmax. Store these persistently."""
    A, D = weight.shape
    a_out = _round_up(A + 2, _LANES)
    wt = jnp.zeros((D, a_out), jnp.float32)
    wt = wt.at[:, :A].set(jnp.transpose(weight).astype(jnp.float32))
    b = jnp.full((1, a_out), _NEG_FILL, dtype=jnp.float32)
    b = b.at[0, :A].set(bias.astype(jnp.float32))
    return wt, b


@functools.partial(jax.jit, static_argnames=("num_actions",))
def policy_net_forward(x, wt_pad, bias_pad, *, num_actions):
    """Discrete PolicyNet.forward(x, test=True).

    x:        (B, input_dim) f32
    wt_pad:   (input_dim, AO) f32   (from prepare_actor_params)
    bias_pad: (1, AO) f32
    Returns (action_env, entropy, log_prob):
      action_env (B,) int32, entropy (B, 1) f32, log_prob (B, num_actions) f32.
    """
    B, D = x.shape
    a_out = wt_pad.shape[1]

    vmem_cap = _vmem_capacity_bytes()
    vmem_limit = min(int(vmem_cap * 0.75), 96 * 1024 * 1024)
    tb_cap = _pick_batch_tile(D, a_out, vmem_limit)
    tb = B if B <= tb_cap else tb_cap        # full-array block needs no 8-row multiple
    grid = (pl.cdiv(B, tb),)                 # ragged last tile handled by Pallas

    cost = pl.CostEstimate(
        flops=2 * B * D * a_out + 8 * B * a_out,
        transcendentals=B * a_out + B,       # exp + log
        bytes_accessed=4 * (B * D + D * a_out + a_out + B * a_out),
    )

    slab = pl.pallas_call(
        functools.partial(_policy_kernel, num_actions=num_actions),
        out_shape=jax.ShapeDtypeStruct((B, a_out), jnp.float32),
        grid=grid,
        in_specs=[
            pl.BlockSpec((tb, D), lambda i: (i, 0)),      # x: pipelined over batch
            pl.BlockSpec((D, a_out), lambda i: (0, 0)),   # weight: resident
            pl.BlockSpec((1, a_out), lambda i: (0, 0)),   # bias: resident
        ],
        out_specs=pl.BlockSpec((tb, a_out), lambda i: (i, 0)),
        compiler_params=pltpu.CompilerParams(
            dimension_semantics=("parallel",),
            vmem_limit_bytes=vmem_limit,
        ),
        cost_estimate=cost,
    )(x, wt_pad, bias_pad)

    # Slice the lane-dense slab apart on device (fused by XLA into one pass).
    log_prob = slab[:, :num_actions]
    entropy = slab[:, num_actions:num_actions + 1]
    action_env = slab[:, num_actions + 1].astype(jnp.int32)
    return action_env, entropy, log_prob


def norm_col_init(key, shape, std=0.01):
    """JAX port of norm_col_init: x = randn(shape); x *= std / sqrt((x**2).sum(1))."""
    x = jax.random.normal(key, shape, dtype=jnp.float32)
    return x * (std / jnp.sqrt(jnp.sum(x * x, axis=1, keepdims=True)))


if __name__ == "__main__":
    # small, deterministic config: discrete head ('cnn_lstm'-style head_name)
    B = 2            # batch
    input_dim = 32   # feature width fed to the actor head
    num_actions = 8  # action_space.n

    key = jax.random.PRNGKey(0)
    kx, kw = jax.random.split(key)

    x = jax.random.normal(kx, (B, input_dim), dtype=jnp.float32)

    # actor_linear parameters, prepared once in the kernel-friendly layout.
    actor_w = norm_col_init(kw, (num_actions, input_dim), std=0.01)
    actor_b = jnp.zeros((num_actions,), dtype=jnp.float32)
    wt_pad, b_pad = prepare_actor_params(actor_w, actor_b)

    action_env, entropy, log_prob = policy_net_forward(
        x, wt_pad, b_pad, num_actions=num_actions)
    jax.block_until_ready((action_env, entropy, log_prob))

    # sanity checks against a pure-JAX reference
    logit_ref = x @ actor_w.T + actor_b
    logp_ref = jax.nn.log_softmax(logit_ref, axis=1)
    prob_ref = jax.nn.softmax(logit_ref, axis=1)
    ent_ref = -jnp.sum(logp_ref * prob_ref, axis=1, keepdims=True)
    act_ref = jnp.argmax(prob_ref, axis=1)

    assert log_prob.shape == (B, num_actions)
    assert entropy.shape == (B, 1)
    assert action_env.shape == (B,)
    assert jnp.allclose(log_prob, logp_ref, atol=3e-5)
    assert jnp.allclose(entropy, ent_ref, atol=3e-5)   # exact divide -> tight tol
    assert jnp.all(action_env == act_ref.astype(jnp.int32))

    print("KERNEL_OK")
</pallas_src>

<mosaic_0001>
module attributes {stable_mosaic.version = 11 : i64} {
  func.func @_policy_kernel(%arg0: i32, %arg1: memref<2x32xf32, #tpu.memory_space<vmem>>, %arg2: memref<32x128xf32, #tpu.memory_space<vmem>>, %arg3: memref<1x128xf32, #tpu.memory_space<vmem>>, %arg4: memref<2x128xf32, #tpu.memory_space<vmem>>) attributes {dimension_semantics = [#tpu.dimension_semantics<parallel>], iteration_bounds = array<i64: 1>, scalar_prefetch = 0 : i64, scratch_operands = 0 : i64, tpu.core_type = #tpu.core_type<tc>, window_params = [{transform_indices = @transform_0, window_bounds = array<i64: 2, 32>}, {pipeline_mode = #tpu.pipeline_mode<synchronous>, transform_indices = @transform_1, window_bounds = array<i64: 32, 128>}, {pipeline_mode = #tpu.pipeline_mode<synchronous>, transform_indices = @transform_2, window_bounds = array<i64: 1, 128>}, {transform_indices = @transform_3, window_bounds = array<i64: 2, 128>}]} {
    %c0 = arith.constant 0 : index
    %c0_0 = arith.constant 0 : index
    %0 = vector.load %arg1[%c0, %c0_0] : memref<2x32xf32, #tpu.memory_space<vmem>>, vector<2x32xf32>
    %c0_1 = arith.constant 0 : index
    %c0_2 = arith.constant 0 : index
    %1 = vector.load %arg2[%c0_1, %c0_2] : memref<32x128xf32, #tpu.memory_space<vmem>>, vector<32x128xf32>
    %c0_3 = arith.constant 0 : index
    %c0_4 = arith.constant 0 : index
    %2 = vector.load %arg3[%c0_3, %c0_4] : memref<1x128xf32, #tpu.memory_space<vmem>>, vector<1x128xf32>
    %cst = arith.constant dense<0.000000e+00> : vector<2x128xf32>
    %3 = tpu.matmul %0, %1, %cst {dimension_numbers = #tpu.dot_dimension_numbers<[1], [0], [0], [1], [0, 0, 1, 1], [], []>} : vector<2x32xf32>, vector<32x128xf32>, vector<2x128xf32> -> vector<2x128xf32>
    %4 = vector.broadcast %2 : vector<1x128xf32> to vector<2x128xf32>
    %5 = arith.addf %3, %4 : vector<2x128xf32>
    %cst_5 = arith.constant dense<0xFF800000> : vector<2xf32>
    %6 = vector.multi_reduction <maximumf>, %5, %cst_5 [1] : vector<2x128xf32> to vector<2xf32>
    %7 = vector.shape_cast %6 : vector<2xf32> to vector<2x1xf32>
    %8 = vector.broadcast %7 : vector<2x1xf32> to vector<2x128xf32>
    %9 = arith.subf %5, %8 : vector<2x128xf32>
    %10 = math.exp %9 : vector<2x128xf32>
    %cst_6 = arith.constant dense<0.000000e+00> : vector<2xf32>
    %11 = vector.multi_reduction <add>, %10, %cst_6 [1] : vector<2x128xf32> to vector<2xf32>
    %12 = vector.shape_cast %11 : vector<2xf32> to vector<2x1xf32>
    %13 = math.log %12 : vector<2x1xf32>
    %14 = vector.broadcast %13 : vector<2x1xf32> to vector<2x128xf32>
    %15 = arith.subf %9, %14 : vector<2x128xf32>
    %16 = arith.mulf %9, %10 : vector<2x128xf32>
    %cst_7 = arith.constant dense<0.000000e+00> : vector<2xf32>
    %17 = vector.multi_reduction <add>, %16, %cst_7 [1] : vector<2x128xf32> to vector<2xf32>
    %18 = vector.shape_cast %17 : vector<2xf32> to vector<2x1xf32>
    %19 = arith.divf %18, %12 : vector<2x1xf32>
    %20 = arith.subf %13, %19 : vector<2x1xf32>
    %21 = tpu.iota {dimensions = array<i32: 1>} : vector<2x128xi32>
    %22 = vector.broadcast %7 : vector<2x1xf32> to vector<2x128xf32>
    %23 = arith.cmpf oeq, %5, %22 : vector<2x128xf32>
    %c128_i32 = arith.constant 128 : i32
    %24 = vector.broadcast %c128_i32 : i32 to vector<2x128xi32>
    %25 = arith.select %23, %21, %24 : vector<2x128xi1>, vector<2x128xi32>
    %cst_8 = arith.constant dense<2147483647> : vector<2xi32>
    %26 = vector.multi_reduction <minsi>, %25, %cst_8 [1] : vector<2x128xi32> to vector<2xi32>
    %27 = vector.shape_cast %26 : vector<2xi32> to vector<2x1xi32>
    %28 = arith.sitofp %27 : vector<2x1xi32> to vector<2x1xf32>
    %c8_i32 = arith.constant 8 : i32
    %29 = vector.broadcast %c8_i32 : i32 to vector<2x128xi32>
    %30 = arith.cmpi eq, %21, %29 : vector<2x128xi32>
    %31 = vector.shape_cast %20 : vector<2x1xf32> to vector<2x1xf32>
    %32 = vector.broadcast %31 : vector<2x1xf32> to vector<2x128xf32>
    %33 = arith.select %30, %32, %15 : vector<2x128xi1>, vector<2x128xf32>
    %c9_i32 = arith.constant 9 : i32
    %34 = vector.broadcast %c9_i32 : i32 to vector<2x128xi32>
    %35 = arith.cmpi eq, %21, %34 : vector<2x128xi32>
    %36 = vector.shape_cast %28 : vector<2x1xf32> to vector<2x1xf32>
    %37 = vector.broadcast %36 : vector<2x1xf32> to vector<2x128xf32>
    %38 = arith.select %35, %37, %33 : vector<2x128xi1>, vector<2x128xf32>
    %c0_9 = arith.constant 0 : index
    %c0_10 = arith.constant 0 : index
    %39 = vector.load %arg4[%c0_9, %c0_10] : memref<2x128xf32, #tpu.memory_space<vmem>>, vector<2x128xf32>
    tpu.vector_store %arg4[%c0_9, %c0_10], %38 {strides = array<i32>} : memref<2x128xf32, #tpu.memory_space<vmem>>, vector<2x128xf32>,
    return
  }
  func.func @transform_0(%arg0: i32) -> (i32, i32) {
    %c0_i32 = arith.constant 0 : i32
    %c0_i32_0 = arith.constant 0 : i32
    return %arg0, %c0_i32 : i32, i32
  }
  func.func @transform_1(%arg0: i32) -> (i32, i32) {
    %c0_i32 = arith.constant 0 : i32
    %c0_i32_0 = arith.constant 0 : i32
    %c0_i32_1 = arith.constant 0 : i32
    return %c0_i32, %c0_i32_0 : i32, i32
  }
  func.func @transform_2(%arg0: i32) -> (i32, i32) {
    %c0_i32 = arith.constant 0 : i32
    %c0_i32_0 = arith.constant 0 : i32
    %c0_i32_1 = arith.constant 0 : i32
    return %c0_i32, %c0_i32_0 : i32, i32
  }
  func.func @transform_3(%arg0: i32) -> (i32, i32) {
    %c0_i32 = arith.constant 0 : i32
    %c0_i32_0 = arith.constant 0 : i32
    return %arg0, %c0_i32 : i32, i32
  }
}

</mosaic_0001>

<bundles_post_ra>
// kernel: policy_net_forward.1
= control target key start
LH: loop header
LB: loop body
LE: loop exit
PB: predicated region body
PF: predicated region fallthrough
CT: control target
= control target key end

     0   :  { %8 = vsyncpa [#allocation3], 0  ;;  %s293_s0 = inlined_call_operand.hbm [shape: f32[2,32], index: 0, kind: input, shape index: {}]   ;;  %s294_s1 = inlined_call_operand.hbm [shape: f32[32,128], index: 1, kind: input, shape index: {}]   ;;  %s295_s2 = inlined_call_operand.vmem [shape: f32[1,128], index: 2, kind: input, shape index: {}]   ;;  %s296_s3 = inlined_call_operand.vmem [shape: f32[2,128], index: 3, kind: output, shape index: {}]  }
   0x1   :  { %9 = vsyncpa [#allocation5], 0  ;;  %s251_s12 = smov [#allocation2]   ;;  %s252_s14 = smov [#allocation4]  }
   0x2   :  { %s16_s13 = sshll.u32 %s251_s12, 4  ;;  %s25_s15 = sshll.u32 %s252_s14, 4  ;;  %s17_s13 = int_to_ptr.vmem [resolvable:$true] %s16_s13  ;;  %s26_s15 = int_to_ptr.vmem [resolvable:$true] %s25_s15 }
   0x3   :  { %s215_s16 = scalar_lea.vmem %s17_s13, 32  ;;  %p220_p1 = scmp.lt.s32.totalorder %s17_s13, %s17_s13 }
   0x4   :  { %p216_p0 = scmp.ne.s32.totalorder %s17_s13, %s215_s16  ;;  %p221_p2 = scmp.lt.s32.totalorder %s215_s16, %s215_s16 }
   0x6   :  { %p222_p3 = por %p221_p2, %p220_p1 }
   0x8   :  { %p223_p4 = pnand %p222_p3, %p216_p0 }
   0xa   :  { %226 = shalt.err (!%p223_p4)
}
   0xb   :  { %19 = dma.hbm_to_vmem [thread:$0]  %s293_s0, 32, %s17_s13, [#allocation3]  }
   0xc   :  { %s235_s19 = scalar_lea.vmem %s26_s15, 512  ;;  %p240_p6 = scmp.lt.s32.totalorder %s26_s15, %s26_s15 }
   0xd   :  { %p236_p5 = scmp.ne.s32.totalorder %s26_s15, %s235_s19  ;;  %p241_p7 = scmp.lt.s32.totalorder %s235_s19, %s235_s19 }
   0xf   :  { %p242_p8 = por %p241_p7, %p240_p6 }
  0x11   :  { %p243_p9 = pnand %p242_p8, %p236_p5 }
  0x13   :  { %246 = shalt.err (!%p243_p9)
}
  0x14   :  { %s253_s20 = smov 128   ;;  %s254_s21 = smov 8  }
  0x15   :  { %31 = dma.hbm_to_vmem [thread:$0]  %s294_s1, 512, %s26_s15, [#allocation5], %s253_s20, %s253_s20, %s254_s21  }
  0x16   :  { %247 = dma.done.wait [#allocation3], 32  }
  0x17   :  { %248 = vsyncadd [#allocation3], 4294967264 }
  0x18   :  { %249 = dma.done.wait [#allocation5], 512  }
  0x19   :  { %250 = vsyncadd [#allocation5], 4294966784  ;;  %v255_v0 = vmov 0.0   ;;  %vm256_vm0 = vmmov 0   ;;  %v44_v1 = vld [vmem:[#allocation4 + $0x18] sm:$0xff]  ;;  %v43_v2 = vld [vmem:[#allocation4 + $0x10] sm:$0xff]  ;;  %v146_v11 = vlaneseq }
  0x1a   :  { %184 = vmatprep.subr.mxu0 %v255_v0  ;;  %192 = vmatprep.mubr.msk.f32.mxu0 %vm256_vm0, %v255_v0  ;;  %v42_v3 = vld [vmem:[#allocation4 + $0x8] sm:$0xff]  ;;  %v41_v4 = vld [vmem:[#allocation4] sm:$0xff]  ;;  %v40_v5 = vld [vmem:[#allocation2] sm:$0x3]  ;;  %vm52_vm1 = vcmask 261120   ;;  %vm126_vm2 = vcmask 1041408  }
  0x1b   :  { %185 = vmatpush3.msra.mxu0 %v44_v1  ;;  %v177_v6 = vld [vmem:[%s295_s2] ss:$0 sm:$0xff]  ;;  %v147_v12 = vand.u32 127, %v146_v11 }
  0x1c   :  { %186 = vmatprep.subr.mxu0 %v255_v0 }
  0x1d   :  { %187 = vmatpush3.msra.mxu0 %v43_v2  ;;  %vm166_vm5 = vcmp.eq.s32.totalorder %v147_v12, 8  ;;  %vm168_vm6 = vcmp.eq.s32.totalorder %v147_v12, 9 }
  0x1e   :  { %188 = vmatprep.subr.mxu0 %v255_v0 }
  0x1f   :  { %189 = vmatpush3.msra.mxu0 %v42_v3 }
  0x20   :  { %190 = vmatprep.subr.mxu0 %v255_v0 }
  0x21   :  { %191 = vmatpush3.msra.mxu0 %v41_v4 }
  0x22   :  { %193 = vmatmul.mubr.msk.f32.vlgmr.msra.gmra.mxu0 %vm52_vm1, %v40_v5 }
  0xe2   :  { %v122_v7 = vpop.f32.mrf.mxu0 }
  0xe3   :  { %v123_v8 = vadd.f32 %v177_v6, %v122_v7 }
  0xe4   :  { %v194_v9 = vpop.f32.mrf.mxu0 }
  0xe5   :  { %v127_v10 = vsel %vm126_vm2, %v123_v8, -inf }
  0xe6   :  { %128 = vmax.xlane.f32.xlu0 %v127_v10 }
 0x16f   :  { %v129_v13 = vpop.xlane.xlu0 %128 }
 0x170   :  { %v130_v14 = vsub.f32 %v123_v8, %v129_v13  ;;  %vm148_vm3 = vcmp.eq.f32.partialorder %v123_v8, %v129_v13 }
 0x171   :  { %v149_v15 = vsel %vm148_vm3, %v147_v12, 128 }
 0x172   :  { %v131_v16 = vmul.f32 1.442695, %v130_v14  ;;  %v150_v17 = vsel %vm126_vm2, %v149_v15, 2147483647 }
 0x173   :  { %v152_v18 = vshra.s32 %v150_v17, 16  ;;  %v151_v24 = vand.u32 65535, %v150_v17 }
 0x174   :  { %201 = vpow2.f32 %v131_v16 }
 0x175   :  { %v154_v19 = vcvt.s32.f32 %v152_v18  ;;  %v153_v26 = vcvt.s32.f32 %v151_v24 }
 0x177   :  { %155 = vmin.xlane.f32.xlu0 %v154_v19 }
 0x181   :  { %v202_v20 = vpop.eup %201 }
 0x182   :  { %v133_v21 = vsel %vm126_vm2, %v202_v20, 0.0  ;;  %v139_v22 = vmul.f32 %v202_v20, %v130_v14 }
 0x183   :  { %134 = vadd.xlane.f32.xlu1 %v133_v21 }
 0x184   :  { %v140_v23 = vsel %vm126_vm2, %v139_v22, 0.0 }
 0x185   :  { %141 = vadd.xlane.f32.xlu0 %v140_v23 }
 0x200   :  { %v156_v25 = vpop.xlane.xlu0 %155 }
 0x201   :  { %vm157_vm4 = vcmp.eq.f32.partialorder %v154_v19, %v156_v25  ;;  %v162_v31 = vcvt.f32.s32 %v156_v25 }
 0x202   :  { %v158_v27 = vsel %vm157_vm4, %v153_v26, inf }
 0x203   :  { %159 = vmin.xlane.f32.xlu1 %v158_v27  ;;  %v163_v36 = vshll.u32 %v162_v31, 16 }
 0x20c   :  { %v135_v28 = vpop.xlane.xlu1 %134 }
 0x20d   :  { %203 = vlog2.f32 %v135_v28 }
 0x20e   :  { %205 = vrcp.f32 %v135_v28  ;;  %v142_v32 = vpop.xlane.xlu0 %141 }
 0x21a   :  { %v204_v29 = vpop.eup %203 }
 0x21b   :  { %v206_v30 = vpop.eup %205  ;;  %v137_v33 = vmul.f32 0.6931472, %v204_v29 }
 0x21c   :  { %v144_v34 = vmul.f32 %v206_v30, %v142_v32 }
 0x21d   :  { %v138_v38 = vsub.f32 %v130_v14, %v137_v33 }
 0x21e   :  { %v145_v39 = vsub.f32 %v137_v33, %v144_v34 }
 0x220   :  { %v167_v42 = vsel %vm166_vm5, %v145_v39, %v138_v38 }
 0x28c   :  { %v160_v35 = vpop.xlane.xlu1 %159 }
 0x28d   :  { %v161_v37 = vcvt.f32.s32 %v160_v35 }
 0x28f   :  { %v164_v40 = vadd.s32 %v163_v36, %v161_v37 }
 0x291   :  { %v165_v41 = vcvt.s32.f32 %v164_v40 }
 0x293   :  { %v169_v43 = vsel %vm168_vm6, %v165_v41, %v167_v42 }
 0x294   :  { %170 = vst [vmem:[%s296_s3] sm:$0x3] %v169_v43 }
 0x295   :  { %175 = vsyncpa [#allocation3], 1 }
 0x296   :  { %176 = vsyncpa [#allocation5], 1 }

</bundles_post_ra>
